<compile_context>
chip_gen: v7x
topology: tpu7x:2x2x1
jax: 0.10.0
libtpu: 0.0.40
codegen_flags: <defaults>
</compile_context>

<pallas_src>
import functools

import jax
import jax.numpy as jnp
from jax.experimental import pallas as pl
from jax.experimental.pallas import tpu as pltpu


def _general_relu_kernel(x_ref, o_ref, *, leak, sub, maxv):
    x = x_ref[...]
    # leaky_relu(x, leak) if leak is not None else relu(x)
    if leak is not None:
        y = jnp.where(x >= 0, x, x * jnp.asarray(leak, x.dtype))
    else:
        y = jnp.maximum(x, jnp.zeros((), x.dtype))
    if sub is not None:
        y = y - jnp.asarray(sub, x.dtype)
    if maxv is not None:
        y = jnp.minimum(y, jnp.asarray(maxv, x.dtype))
    o_ref[...] = y


def _general_relu_ref(x, leak=None, sub=None, maxv=None):
    """Pure-JAX reference matching PyTorch semantics (also the odd-size fallback)."""
    if leak is not None:
        y = jnp.where(x >= 0, x, x * jnp.asarray(leak, x.dtype))
    else:
        y = jnp.maximum(x, jnp.zeros((), x.dtype))
    if sub is not None:
        y = y - jnp.asarray(sub, x.dtype)
    if maxv is not None:
        y = jnp.minimum(y, jnp.asarray(maxv, x.dtype))
    return y.astype(x.dtype)


def _tpu_tuning():
    """Return (target_block_bytes, min_grid_steps) for the current TPU generation."""
    kind = ""
    try:
        kind = jax.devices()[0].device_kind.lower()
    except Exception:
        pass
    is_v5e = ("v5 lite" in kind) or ("v5e" in kind) or ("v5litepod" in kind)
    is_v7 = ("v7" in kind) or ("tpu7" in kind) or ("7x" in kind)
    if is_v5e:
        # v5e: 16 MiB scoped-VMEM default and the lowest HBM BW; 2 MiB blocks
        # (double-buffered in+out = 8 MiB) already sit at >=85% of roofline.
        return 2 * 1024 * 1024, 1
    if is_v7:
        # v7x: 2 TensorCores per chip -> keep >=2 grid steps so the "parallel"
        # axis can shard across cores; 4 MiB blocks (16 MiB of buffers) fit the
        # 32 MiB scoped / 64 MiB physical VMEM comfortably.
        return 4 * 1024 * 1024, 2
    # v6e / default: single TC, 32 MiB scoped default -> 4 MiB blocks, no forced split.
    return 4 * 1024 * 1024, 1


def _choose_layout(n_elems, itemsize, target_bytes, min_steps):
    """Pick (lanes, rows, block_rows) for a lane-dense 2D slab. Needs n_elems % 128 == 0."""
    lanes = 128
    for cand in (1024, 512, 256, 128):
        if n_elems % cand == 0:
            lanes = cand
            break
    rows = n_elems // lanes

    # Sub-32-bit dtypes pack along sublanes (native tiles: (8,128) f32, (16,128) bf16,
    # (32,128) int8/fp8) -> keep block_rows a multiple of the packed sublane count so
    # stores stay unmasked full-width vst and no VMEM relayout is needed.
    sublane_mult = 8 * max(1, 4 // itemsize)

    total_bytes = n_elems * itemsize
    if rows <= sublane_mult or (total_bytes <= target_bytes and min_steps <= 1):
        # Single full-extent block (block dims equal the array dims, so the (8,128)
        # divisibility constraint does not apply).
        return lanes, rows, rows

    # Target ~2-4 MiB blocks: big enough to amortize the ~0.35 us per-grid-step
    # overhead, small enough that double-buffered in + out fits scoped VMEM.
    br = max(sublane_mult, target_bytes // (lanes * itemsize))
    br = min(br, -(-rows // min_steps))                   # keep >= min_steps grid steps
    br = max(sublane_mult, (br // sublane_mult) * sublane_mult)
    br = min(br, rows)
    return lanes, rows, br


@functools.partial(jax.jit, static_argnames=("leak", "sub", "maxv"))
def general_relu(x, leak=None, sub=None, maxv=None):
    """Apply GeneralRelu elementwise to an NCHW (or any-shape) array via Pallas."""
    orig_shape = x.shape
    dtype = x.dtype
    n_elems = x.size
    itemsize = x.dtype.itemsize

    # Rare path for NCHW activations: flat length not a multiple of 128 lanes.
    # A pad + kernel + slice round-trip costs ~2 extra full-array HBM passes, so
    # route those shapes to the plain-XLA elementwise path (1 read + 1 write).
    if n_elems == 0 or n_elems % 128 != 0:
        return _general_relu_ref(x, leak=leak, sub=sub, maxv=maxv)

    target_bytes, min_steps = _tpu_tuning()
    lanes, rows, block_rows = _choose_layout(n_elems, itemsize, target_bytes, min_steps)

    x2d = x.reshape(rows, lanes)
    kernel = functools.partial(_general_relu_kernel, leak=leak, sub=sub, maxv=maxv)
    grid = (pl.cdiv(rows, block_rows),)  # partial last block is masked by Pallas

    out2d = pl.pallas_call(
        kernel,
        out_shape=jax.ShapeDtypeStruct((rows, lanes), dtype),
        grid_spec=pltpu.PrefetchScalarGridSpec(
            num_scalar_prefetch=0,
            grid=grid,
            in_specs=[pl.BlockSpec((block_rows, lanes), lambda i: (i, 0))],
            out_specs=pl.BlockSpec((block_rows, lanes), lambda i: (i, 0)),
        ),
        # TODO(synk): on v7x, verify with a profile that the 1-D "parallel" grid
        # shards across both TensorCores; switch to pltpu.CORE_PARALLEL if not.
        compiler_params=pltpu.CompilerParams(
            dimension_semantics=("parallel",),
        ),
        # NOTE: no input_output_aliases here. Aliasing a non-donated jit argument
        # makes XLA insert a defensive full-array copy in front of the call (~2x
        # slowdown on a one-pass mem-bound kernel) and saves no bandwidth. Callers
        # that can give up the input may wrap with jax.jit(donate_argnums=0) and
        # re-add the alias purely to save HBM footprint.
    )(x2d)

    return out2d.reshape(orig_shape)


if __name__ == "__main__":
    key = jax.random.PRNGKey(0)
    # NCHW input, small shapes (like the PyTorch module would see)
    x = jax.random.normal(key, (2, 4, 16, 16), dtype=jnp.float32)

    # Config 1: GeneralRelu(leak=0.1, sub=0.4, maxv=6.0)
    out1 = jax.block_until_ready(general_relu(x, leak=0.1, sub=0.4, maxv=6.0))
    ref1 = _general_relu_ref(x, leak=0.1, sub=0.4, maxv=6.0)
    assert out1.shape == x.shape and out1.dtype == x.dtype
    assert jnp.allclose(out1, ref1, atol=1e-6, rtol=1e-6)

    # Config 2: GeneralRelu() -> plain ReLU
    out2 = jax.block_until_ready(general_relu(x))
    ref2 = _general_relu_ref(x)
    assert jnp.allclose(out2, ref2, atol=1e-6, rtol=1e-6)

    # Config 3: odd-sized input -> non-multiple-of-128 fallback (plain XLA path).
    x3 = jax.random.normal(jax.random.PRNGKey(1), (3, 5, 7, 9), dtype=jnp.float32)
    out3 = jax.block_until_ready(general_relu(x3, leak=0.2))
    ref3 = _general_relu_ref(x3, leak=0.2)
    assert jnp.allclose(out3, ref3, atol=1e-6, rtol=1e-6)

    # Config 4: bf16 input (packed sublane multiple = 16) through the kernel path.
    x4 = jax.random.normal(jax.random.PRNGKey(2), (2, 8, 16, 16), dtype=jnp.bfloat16)
    out4 = jax.block_until_ready(general_relu(x4, leak=0.1, sub=0.4, maxv=6.0))
    ref4 = _general_relu_ref(x4, leak=0.1, sub=0.4, maxv=6.0)
    assert out4.shape == x4.shape and out4.dtype == x4.dtype
    assert jnp.allclose(out4.astype(jnp.float32), ref4.astype(jnp.float32),
                        atol=2e-2, rtol=2e-2)

    # Config 5: larger f32 input (~5 MiB) exercising the multi-step grid path.
    x5 = jax.random.normal(jax.random.PRNGKey(3), (8, 160, 32, 32), dtype=jnp.float32)
    out5 = jax.block_until_ready(general_relu(x5, leak=0.1, sub=0.4, maxv=6.0))
    ref5 = _general_relu_ref(x5, leak=0.1, sub=0.4, maxv=6.0)
    assert jnp.allclose(out5, ref5, atol=1e-6, rtol=1e-6)

    print("KERNEL_OK")
</pallas_src>

<mosaic_0001>
module attributes {stable_mosaic.version = 11 : i64} {
  func.func @_general_relu_kernel(%arg0: i32, %arg1: memref<2x1024xf32, #tpu.memory_space<vmem>>, %arg2: memref<2x1024xf32, #tpu.memory_space<vmem>>) attributes {dimension_semantics = [#tpu.dimension_semantics<parallel>], iteration_bounds = array<i64: 1>, scalar_prefetch = 0 : i64, scratch_operands = 0 : i64, tpu.core_type = #tpu.core_type<tc>, window_params = [{transform_indices = @transform_0, window_bounds = array<i64: 2, 1024>}, {transform_indices = @transform_1, window_bounds = array<i64: 2, 1024>}]} {
    %c0 = arith.constant 0 : index
    %c0_0 = arith.constant 0 : index
    %0 = vector.load %arg1[%c0, %c0_0] : memref<2x1024xf32, #tpu.memory_space<vmem>>, vector<2x1024xf32>
    %cst = arith.constant 0.000000e+00 : f32
    %1 = vector.broadcast %cst : f32 to vector<2x1024xf32>
    %2 = arith.cmpf oge, %0, %1 : vector<2x1024xf32>
    %cst_1 = arith.constant 1.000000e-01 : f32
    %3 = vector.broadcast %cst_1 : f32 to vector<2x1024xf32>
    %4 = arith.mulf %0, %3 : vector<2x1024xf32>
    %5 = arith.select %2, %0, %4 : vector<2x1024xi1>, vector<2x1024xf32>
    %cst_2 = arith.constant 4.000000e-01 : f32
    %6 = vector.broadcast %cst_2 : f32 to vector<2x1024xf32>
    %7 = arith.subf %5, %6 : vector<2x1024xf32>
    %cst_3 = arith.constant 6.000000e+00 : f32
    %8 = vector.broadcast %cst_3 : f32 to vector<2x1024xf32>
    %9 = arith.minimumf %7, %8 : vector<2x1024xf32>
    %c0_4 = arith.constant 0 : index
    %c0_5 = arith.constant 0 : index
    %10 = vector.load %arg2[%c0_4, %c0_5] : memref<2x1024xf32, #tpu.memory_space<vmem>>, vector<2x1024xf32>
    tpu.vector_store %arg2[%c0_4, %c0_5], %9 {strides = array<i32>} : memref<2x1024xf32, #tpu.memory_space<vmem>>, vector<2x1024xf32>,
    return
  }
  func.func @transform_0(%arg0: i32) -> (i32, i32) {
    %c0_i32 = arith.constant 0 : i32
    %c0_i32_0 = arith.constant 0 : i32
    return %arg0, %c0_i32 : i32, i32
  }
  func.func @transform_1(%arg0: i32) -> (i32, i32) {
    %c0_i32 = arith.constant 0 : i32
    %c0_i32_0 = arith.constant 0 : i32
    return %arg0, %c0_i32 : i32, i32
  }
}

</mosaic_0001>

<bundles_post_ra>
// kernel: general_relu.1
= control target key start
LH: loop header
LB: loop body
LE: loop exit
PB: predicated region body
PF: predicated region fallthrough
CT: control target
= control target key end

     0   :  { %s50_s0 = inlined_call_operand.vmem [shape: f32[2,1024], index: 0, kind: input, shape index: {}]   ;;  %s51_s1 = inlined_call_operand.vmem [shape: f32[2,1024], index: 1, kind: output, shape index: {}]  }
   0x1   :  { %v8_v0 = vld [vmem:[%s50_s0] sm:$0xff]  ;;  %v9_v1 = vld [vmem:[%s50_s0 + $0x8] sm:$0xff] }
   0x2   :  { %vm10_vm0 = vcmp.ge.f32.partialorder %v8_v0, 0.0  ;;  %v12_v2 = vmul.f32 0.1, %v8_v0  ;;  %vm11_vm1 = vcmp.ge.f32.partialorder %v9_v1, 0.0  ;;  %v13_v3 = vmul.f32 0.1, %v9_v1 }
   0x4   :  { %v14_v4 = vsel %vm10_vm0, %v8_v0, %v12_v2  ;;  %v15_v5 = vsel %vm11_vm1, %v9_v1, %v13_v3 }
   0x5   :  { %v26_v6 = vadd.f32 -0.4, %v14_v4  ;;  %v27_v7 = vadd.f32 -0.4, %v15_v5 }
   0x7   :  { %v18_v8 = vmin.f32 %v26_v6, 6.0  ;;  %v19_v9 = vmin.f32 %v27_v7, 6.0 }
   0x9   :  { %20 = vst [vmem:[%s51_s1] sm:$0xff] %v18_v8  ;;  %21 = vst [vmem:[%s51_s1 + $0x8] sm:$0xff] %v19_v9 }

</bundles_post_ra>
